<compile_context>
chip_gen: v7x
topology: tpu7x:2x2x1
jax: 0.10.0
libtpu: 0.0.40
codegen_flags: <defaults>
</compile_context>

<pallas_src>
import functools

import jax
import jax.numpy as jnp
from jax.experimental import pallas as pl
from jax.experimental.pallas import tpu as pltpu

PAD_MODE = "reflect"
EPS = 1e-5
NEG_SLOPE = 0.2


def _round_up(x, m):
    return ((x + m - 1) // m) * m


@functools.lru_cache(maxsize=None)
def _vmem_limit_bytes():
    """Generation-aware scoped-VMEM cap: ~3/4 of physical VMEM, capped at 96 MiB."""
    cap = 64 * 1024 * 1024
    try:
        cap = int(getattr(pltpu.get_tpu_info(), "vmem_capacity_bytes", cap))
    except Exception:
        pass  # fall back to a conservative (v7x-safe) default
    return min((cap * 3) // 4, 96 * 1024 * 1024)


def _choose_tk(K, P, vmem_limit):
    """Largest K tile (multiple of 128 dividing K, or full K) whose double-buffered
    bf16 patches block fits in ~1/4 of the scoped VMEM limit."""
    budget = vmem_limit // 4

    def fits(t):
        return 2 * (P * t * 2) <= budget  # 2 pipeline buffers, bf16

    if K % 128 != 0 or fits(K):
        return K
    cands = [t for t in range(K - 128, 0, -128) if K % t == 0]  # descending
    for t in cands:
        if fits(t):
            return t
    return cands[-1] if cands else K


def _choose_p_chunk(P, max_chunk=1024):
    """Epilogue spatial chunk: divides P, multiple of 8, bounded; else whole P."""
    if P <= max_chunk:
        return P
    start = max_chunk - (max_chunk % 8)
    for c in range(start, 7, -8):
        if P % c == 0:
            return c
    return P


def _scale_shift(s, ss, inv_p):
    """One-pass InstanceNorm stats: y_norm = y * scale - shift."""
    mean = s * inv_p
    var = jnp.maximum(ss * inv_p - mean * mean, 0.0)
    scale = jax.lax.rsqrt(var + EPS)
    shift = mean * scale
    return scale, shift


def _norm_lrelu_epilogue(o_ref, p_chunk):
    """In-place InstanceNorm (affine=False) + LeakyReLU(0.2) over o_ref[0] : (P, C)."""
    P, C = o_ref.shape[1], o_ref.shape[2]
    n_chunks = P // p_chunk
    inv_p = 1.0 / P

    if n_chunks == 1:
        y = o_ref[0]                                           # (P, C) f32
        ones = jnp.ones((1, P), jnp.float32)
        s = jnp.dot(ones, y, preferred_element_type=jnp.float32)
        ss = jnp.dot(ones, y * y, preferred_element_type=jnp.float32)
        scale, shift = _scale_shift(s, ss, inv_p)
        yn = y * scale - shift
        o_ref[0] = jnp.where(yn >= 0, yn, NEG_SLOPE * yn)
        return

    # Chunked path: bounds epilogue temporaries to (p_chunk, C) instead of (P, C).
    def _off(i):
        off = i * p_chunk
        if p_chunk % 8 == 0:
            off = pl.multiple_of(off, p_chunk)
        return off

    ones = jnp.ones((1, p_chunk), jnp.float32)

    def stats_body(i, carry):
        s, ss = carry
        yc = o_ref[0, pl.ds(_off(i), p_chunk), :]
        s = s + jnp.dot(ones, yc, preferred_element_type=jnp.float32)
        ss = ss + jnp.dot(ones, yc * yc, preferred_element_type=jnp.float32)
        return s, ss

    zeros = jnp.zeros((1, C), jnp.float32)
    s, ss = jax.lax.fori_loop(0, n_chunks, stats_body, (zeros, zeros))
    scale, shift = _scale_shift(s, ss, inv_p)

    def norm_body(i, carry):
        idx = (0, pl.ds(_off(i), p_chunk), slice(None))
        yn = o_ref[idx] * scale - shift
        o_ref[idx] = jnp.where(yn >= 0, yn, NEG_SLOPE * yn)
        return carry

    jax.lax.fori_loop(0, n_chunks, norm_body, 0)


def _block_kernel(patches_ref, w_ref, o_ref, *, p_chunk):
    # patches_ref: (1, P, tk)    bf16 — one sample's im2col slab, K on lanes
    # w_ref:       (K, C_pad)    bf16 — full flattened weight, resident (constant index)
    # o_ref:       (1, P, C_pad) f32  — resident across the K axis; doubles as accumulator
    k = pl.program_id(1)
    tk = patches_ref.shape[2]
    nk = w_ref.shape[0] // tk

    x = patches_ref[0]                                          # (P, tk)
    if nk == 1:
        w = w_ref[...]
    else:
        w = w_ref[pl.ds(pl.multiple_of(k * tk, tk), tk), :]     # (tk, C_pad)
    prod = jnp.dot(x, w, preferred_element_type=jnp.float32)    # (P, C_pad) f32

    if nk == 1:
        o_ref[0] = prod
        _norm_lrelu_epilogue(o_ref, p_chunk)
    else:
        @pl.when(k == 0)
        def _init():
            o_ref[0] = prod

        @pl.when(k > 0)
        def _accumulate():
            o_ref[0] += prod

        @pl.when(k == nk - 1)
        def _finish():
            _norm_lrelu_epilogue(o_ref, p_chunk)


@functools.partial(jax.jit, static_argnames=("stride", "tk", "p_chunk"))
def block_forward(x, weight, bias, stride, *, tk=None, p_chunk=None):
    """x: (N, C_in, H, W) f32; weight: (C_out, C_in, 4, 4); bias: (C_out,).

    `bias` is intentionally unused: InstanceNorm2d(affine=False) subtracts the
    per-(n, c) mean, so a per-channel constant added before the norm is a no-op.
    """
    del bias
    N, C_in, H, W = x.shape
    C_out, _, KH, KW = weight.shape
    pad = 1

    # --- glue: reflect pad + im2col in (N, P, K) order (P-major, K on lanes) ---
    xp = jnp.pad(x, ((0, 0), (0, 0), (pad, pad), (pad, pad)), mode=PAD_MODE)
    H_out = (H + 2 * pad - KH) // stride + 1
    W_out = (W + 2 * pad - KW) // stride + 1
    P = H_out * W_out
    K = C_in * KH * KW

    patches = jax.lax.conv_general_dilated_patches(
        xp, filter_shape=(KH, KW), window_strides=(stride, stride),
        padding="VALID", dimension_numbers=("NCHW", "OIHW", "NHWC"),
    )  # (N, H_out, W_out, K); feature order = (C_in, KH, KW)
    patches = patches.reshape(N, P, K).astype(jnp.bfloat16)

    # Weight: (C_out, K) -> (K, C_out), zero-padded to lane-dense C_pad, bf16.
    C_pad = _round_up(C_out, 128)
    w_flat = weight.reshape(C_out, K).T
    w_flat = jnp.pad(w_flat, ((0, 0), (0, C_pad - C_out))).astype(jnp.bfloat16)

    vmem_limit = _vmem_limit_bytes()
    if tk is None:
        tk = _choose_tk(K, P, vmem_limit)
    assert K % tk == 0 and (tk == K or tk % 128 == 0), (K, tk)
    nk = K // tk

    if p_chunk is None:
        p_chunk = _choose_p_chunk(P)
    assert P % p_chunk == 0, (P, p_chunk)

    out = pl.pallas_call(
        functools.partial(_block_kernel, p_chunk=p_chunk),
        out_shape=jax.ShapeDtypeStruct((N, P, C_pad), jnp.float32),
        grid_spec=pltpu.PrefetchScalarGridSpec(
            num_scalar_prefetch=0,
            grid=(N, nk),
            in_specs=[
                # one sample's patches, K-tiled (double-buffered by the pipeline)
                pl.BlockSpec((1, P, tk), lambda n, k: (n, 0, k)),
                # full weight, constant block index -> DMA'd from HBM exactly once
                pl.BlockSpec((K, C_pad), lambda n, k: (0, 0)),
            ],
            out_specs=pl.BlockSpec((1, P, C_pad), lambda n, k: (n, 0, 0)),
        ),
        compiler_params=pltpu.CompilerParams(
            dimension_semantics=("parallel", "arbitrary"),
            vmem_limit_bytes=vmem_limit,
        ),
    )(patches, w_flat)

    out = out[:, :, :C_out]       # drop channel padding (fuses with the reshape below)
    # back to NCHW (module contract)
    return out.reshape(N, H_out, W_out, C_out).transpose(0, 3, 1, 2)


def reference_forward(x, weight, bias, stride):
    """Pure-JAX reference (reflect pad + conv(+bias) + instance norm + leaky relu), f32."""
    xp = jnp.pad(x, ((0, 0), (0, 0), (1, 1), (1, 1)), mode=PAD_MODE)
    y = jax.lax.conv_general_dilated(
        xp, weight, window_strides=(stride, stride), padding="VALID",
        dimension_numbers=("NCHW", "OIHW", "NCHW"))
    y = y + bias.reshape(1, -1, 1, 1)
    mean = jnp.mean(y, axis=(2, 3), keepdims=True)
    var = jnp.mean((y - mean) ** 2, axis=(2, 3), keepdims=True)
    yn = (y - mean) * jax.lax.rsqrt(var + EPS)
    return jnp.where(yn >= 0, yn, NEG_SLOPE * yn)


if __name__ == "__main__":
    key = jax.random.PRNGKey(0)

    def make_params(k, c_in, c_out):
        k1, k2, k3 = jax.random.split(k, 3)
        fan_in = c_in * 16
        bound = 1.0 / (fan_in ** 0.5)
        w = jax.random.uniform(k1, (c_out, c_in, 4, 4), jnp.float32, -bound, bound)
        b = jax.random.uniform(k2, (c_out,), jnp.float32, -bound, bound)
        return k3, w, b

    # Case 1: stride 2, tiny channels (K=64 -> single K step); p_chunk=32 (< P=64)
    # exercises the chunked instance-norm epilogue path.
    key, kx = jax.random.split(key)
    x1 = jax.random.normal(kx, (2, 4, 16, 16), dtype=jnp.float32)
    key, w1, b1 = make_params(key, 4, 8)
    out1 = jax.block_until_ready(block_forward(x1, w1, b1, 2, p_chunk=32))
    ref1 = jax.block_until_ready(reference_forward(x1, w1, b1, 2))
    assert out1.shape == (2, 8, 8, 8), out1.shape
    err1 = float(jnp.max(jnp.abs(out1 - ref1)))
    assert jnp.allclose(out1, ref1, atol=3e-2, rtol=3e-2), err1

    # Case 2: stride 1, K=256 with tk=128 -> 2 K steps; exercises the accumulate-into-
    # o_ref path and the non-multiple-of-8 spatial size (P = 15*15 = 225).
    key, kx = jax.random.split(key)
    x2 = jax.random.normal(kx, (2, 16, 16, 16), dtype=jnp.float32)
    key, w2, b2 = make_params(key, 16, 32)
    out2 = jax.block_until_ready(block_forward(x2, w2, b2, 1, tk=128))
    ref2 = jax.block_until_ready(reference_forward(x2, w2, b2, 1))
    assert out2.shape == (2, 32, 15, 15), out2.shape
    err2 = float(jnp.max(jnp.abs(out2 - ref2)))
    assert jnp.allclose(out2, ref2, atol=3e-2, rtol=3e-2), err2

    print("KERNEL_OK")
</pallas_src>

<mosaic_0001>
module attributes {stable_mosaic.version = 11 : i64} {
  func.func @_block_kernel(%arg0: i32, %arg1: i32, %arg2: memref<1x64x64xbf16, #tpu.memory_space<vmem>>, %arg3: memref<64x128xbf16, #tpu.memory_space<vmem>>, %arg4: memref<1x64x128xf32, #tpu.memory_space<vmem>>) attributes {dimension_semantics = [#tpu.dimension_semantics<parallel>, #tpu.dimension_semantics<arbitrary>], iteration_bounds = array<i64: 2, 1>, scalar_prefetch = 0 : i64, scratch_operands = 0 : i64, tpu.core_type = #tpu.core_type<tc>, window_params = [{transform_indices = @transform_0, window_bounds = array<i64: 1, 64, 64>}, {pipeline_mode = #tpu.pipeline_mode<synchronous>, transform_indices = @transform_1, window_bounds = array<i64: 64, 128>}, {transform_indices = @transform_2, window_bounds = array<i64: 1, 64, 128>}]} {
    %c0 = arith.constant 0 : index
    %c0_0 = arith.constant 0 : index
    %c0_1 = arith.constant 0 : index
    %0 = vector.load %arg2[%c0, %c0_0, %c0_1] : memref<1x64x64xbf16, #tpu.memory_space<vmem>>, vector<1x64x64xbf16>
    %1 = vector.shape_cast %0 : vector<1x64x64xbf16> to vector<64x64xbf16>
    %c0_2 = arith.constant 0 : index
    %c0_3 = arith.constant 0 : index
    %2 = vector.load %arg3[%c0_2, %c0_3] : memref<64x128xbf16, #tpu.memory_space<vmem>>, vector<64x128xbf16>
    %cst = arith.constant dense<0.000000e+00> : vector<64x128xf32>
    %3 = tpu.matmul %1, %2, %cst {dimension_numbers = #tpu.dot_dimension_numbers<[1], [0], [0], [1], [0, 0, 1, 1], [], []>} : vector<64x64xbf16>, vector<64x128xbf16>, vector<64x128xf32> -> vector<64x128xf32>
    %c0_4 = arith.constant 0 : index
    %c0_5 = arith.constant 0 : index
    %c0_6 = arith.constant 0 : index
    %4 = vector.load %arg4[%c0_4, %c0_5, %c0_6] : memref<1x64x128xf32, #tpu.memory_space<vmem>>, vector<1x64x128xf32>
    %5 = vector.shape_cast %4 : vector<1x64x128xf32> to vector<64x128xf32>
    %6 = vector.shape_cast %3 : vector<64x128xf32> to vector<1x64x128xf32>
    tpu.vector_store %arg4[%c0_4, %c0_5, %c0_6], %6 {strides = array<i32>} : memref<1x64x128xf32, #tpu.memory_space<vmem>>, vector<1x64x128xf32>,
    %cst_7 = arith.constant 1.000000e+00 : f32
    %7 = vector.broadcast %cst_7 : f32 to vector<1x32xf32>
    %cst_8 = arith.constant 0.000000e+00 : f32
    %8 = vector.broadcast %cst_8 : f32 to vector<1x128xf32>
    %c0_i32 = arith.constant 0 : i32
    %c2_i32 = arith.constant 2 : i32
    %9 = arith.addi %c0_i32, %c2_i32 : i32
    %c1_i32 = arith.constant 1 : i32
    %10:2 = scf.for %arg5 = %c0_i32 to %9 step %c1_i32 iter_args(%arg6 = %8, %arg7 = %8) -> (vector<1x128xf32>, vector<1x128xf32>)  : i32 {
      %c32_i32 = arith.constant 32 : i32
      %24 = arith.muli %arg5, %c32_i32 : i32
      %25 = tpu.assume_multiple %24, 32 : i32
      %c0_18 = arith.constant 0 : index
      %26 = arith.index_cast %25 : i32 to index
      %c0_19 = arith.constant 0 : index
      %27 = vector.load %arg4[%c0_18, %26, %c0_19] : memref<1x64x128xf32, #tpu.memory_space<vmem>>, vector<1x32x128xf32>
      %28 = vector.shape_cast %27 : vector<1x32x128xf32> to vector<32x128xf32>
      %cst_20 = arith.constant dense<0.000000e+00> : vector<1x128xf32>
      %29 = tpu.matmul %7, %28, %cst_20 {dimension_numbers = #tpu.dot_dimension_numbers<[1], [0], [0], [1], [0, 0, 1, 1], [], []>} : vector<1x32xf32>, vector<32x128xf32>, vector<1x128xf32> -> vector<1x128xf32>
      %30 = arith.addf %arg6, %29 : vector<1x128xf32>
      %31 = arith.mulf %28, %28 : vector<32x128xf32>
      %cst_21 = arith.constant dense<0.000000e+00> : vector<1x128xf32>
      %32 = tpu.matmul %7, %31, %cst_21 {dimension_numbers = #tpu.dot_dimension_numbers<[1], [0], [0], [1], [0, 0, 1, 1], [], []>} : vector<1x32xf32>, vector<32x128xf32>, vector<1x128xf32> -> vector<1x128xf32>
      %33 = arith.addf %arg7, %32 : vector<1x128xf32>
      scf.yield %30, %33 : vector<1x128xf32>, vector<1x128xf32>
    }
    %c2_i32_9 = arith.constant 2 : i32
    %cst_10 = arith.constant 1.562500e-02 : f32
    %11 = vector.broadcast %cst_10 : f32 to vector<1x128xf32>
    %12 = arith.mulf %10#0, %11 : vector<1x128xf32>
    %cst_11 = arith.constant 1.562500e-02 : f32
    %13 = vector.broadcast %cst_11 : f32 to vector<1x128xf32>
    %14 = arith.mulf %10#1, %13 : vector<1x128xf32>
    %15 = arith.mulf %12, %12 : vector<1x128xf32>
    %16 = arith.subf %14, %15 : vector<1x128xf32>
    %cst_12 = arith.constant 0.000000e+00 : f32
    %17 = vector.broadcast %cst_12 : f32 to vector<1x128xf32>
    %18 = arith.maximumf %16, %17 : vector<1x128xf32>
    %cst_13 = arith.constant 9.99999974E-6 : f32
    %19 = vector.broadcast %cst_13 : f32 to vector<1x128xf32>
    %20 = arith.addf %18, %19 : vector<1x128xf32>
    %21 = math.rsqrt %20 : vector<1x128xf32>
    %22 = arith.mulf %12, %21 : vector<1x128xf32>
    %c0_i32_14 = arith.constant 0 : i32
    %c2_i32_15 = arith.constant 2 : i32
    %23 = arith.addi %c0_i32_14, %c2_i32_15 : i32
    %c1_i32_16 = arith.constant 1 : i32
    scf.for %arg5 = %c0_i32_14 to %23 step %c1_i32_16  : i32 {
      %c32_i32 = arith.constant 32 : i32
      %24 = arith.muli %arg5, %c32_i32 : i32
      %25 = tpu.assume_multiple %24, 32 : i32
      %c0_18 = arith.constant 0 : index
      %26 = arith.index_cast %25 : i32 to index
      %c0_19 = arith.constant 0 : index
      %27 = vector.load %arg4[%c0_18, %26, %c0_19] : memref<1x64x128xf32, #tpu.memory_space<vmem>>, vector<1x32x128xf32>
      %28 = vector.shape_cast %27 : vector<1x32x128xf32> to vector<32x128xf32>
      %29 = vector.broadcast %21 : vector<1x128xf32> to vector<32x128xf32>
      %30 = arith.mulf %28, %29 : vector<32x128xf32>
      %31 = vector.broadcast %22 : vector<1x128xf32> to vector<32x128xf32>
      %32 = arith.subf %30, %31 : vector<32x128xf32>
      %cst_20 = arith.constant 0.000000e+00 : f32
      %33 = vector.broadcast %cst_20 : f32 to vector<32x128xf32>
      %34 = arith.cmpf oge, %32, %33 : vector<32x128xf32>
      %cst_21 = arith.constant 2.000000e-01 : f32
      %35 = vector.broadcast %cst_21 : f32 to vector<32x128xf32>
      %36 = arith.mulf %35, %32 : vector<32x128xf32>
      %37 = arith.select %34, %32, %36 : vector<32x128xi1>, vector<32x128xf32>
      %c0_22 = arith.constant 0 : index
      %38 = arith.index_cast %25 : i32 to index
      %c0_23 = arith.constant 0 : index
      %39 = vector.load %arg4[%c0_22, %38, %c0_23] : memref<1x64x128xf32, #tpu.memory_space<vmem>>, vector<1x32x128xf32>
      %40 = vector.shape_cast %39 : vector<1x32x128xf32> to vector<32x128xf32>
      %41 = vector.shape_cast %37 : vector<32x128xf32> to vector<1x32x128xf32>
      tpu.vector_store %arg4[%c0_22, %38, %c0_23], %41 {strides = array<i32>} : memref<1x64x128xf32, #tpu.memory_space<vmem>>, vector<1x32x128xf32>,
    }
    %c2_i32_17 = arith.constant 2 : i32
    return
  }
  func.func @transform_0(%arg0: i32, %arg1: i32) -> (i32, i32, i32) {
    %c0_i32 = arith.constant 0 : i32
    %c0_i32_0 = arith.constant 0 : i32
    return %arg0, %c0_i32, %arg1 : i32, i32, i32
  }
  func.func @transform_1(%arg0: i32, %arg1: i32) -> (i32, i32) {
    %c0_i32 = arith.constant 0 : i32
    %c0_i32_0 = arith.constant 0 : i32
    %c0_i32_1 = arith.constant 0 : i32
    return %c0_i32, %c0_i32_0 : i32, i32
  }
  func.func @transform_2(%arg0: i32, %arg1: i32) -> (i32, i32, i32) {
    %c0_i32 = arith.constant 0 : i32
    %c0_i32_0 = arith.constant 0 : i32
    %c0_i32_1 = arith.constant 0 : i32
    return %arg0, %c0_i32, %c0_i32_0 : i32, i32, i32
  }
}

</mosaic_0001>

<bundles_post_ra>
// kernel: block_forward.1
= control target key start
LH: loop header
LB: loop body
LE: loop exit
PB: predicated region body
PF: predicated region fallthrough
CT: control target
= control target key end

     0   :  { %s869_s9 = smov 0   ;;  %s871_s10 = smov 0   ;;  %s962_s0 = inlined_call_operand.vmem [shape: bf16[2,64,64], index: 0, kind: input, shape index: {}]   ;;  %s963_s1 = inlined_call_operand.vmem [shape: bf16[64,128], index: 1, kind: input, shape index: {}]   ;;  %s964_s2 = inlined_call_operand.vmem [shape: f32[2,64,128], index: 2, kind: output, shape index: {}]  }
   0x1   :  { %s873_s11 = smov 0  }
   0x2 LB: > { %s24_s12 = sadd.s32 1, %s828_s10  ;;  %p623_p0 = scmp.ge.s32.totalorder %s832_s11, 1  ;;  %s832_s11 = sphi %s873_s11, %s12_s11   ;;  %s828_s10 = sphi %s871_s10, %s966_s10   ;;  %s824_s9 = sphi %s869_s9, %s965_s9  }
   0x3   : > { %p26_p1 = scmp.ge.s32.totalorder %s24_s12, 2  ;;  %p129_p2 = scmp.lt.s32.totalorder %s832_s11, 3 }
   0x5   : > { %s968_s12 = smov (%p26_p1, %s24_s12), 0  ;;  %p130_p3 = pnand %p623_p0, %p129_p2 }
   0x6   : > { %v784_v0 = vld [vmem:[%s963_s1] sm:$0xff] (!%p130_p3)   ;;  %p154_p4 = scmp.lt.s32.totalorder (!%p130_p3), %s824_s9, 1  ;;  %v785_v1 = vld [vmem:[%s963_s1 + $0x8] sm:$0xff] (!%p130_p3)   ;;  %v786_v2 = vld [vmem:[%s963_s1 + $0x10] sm:$0xff] (!%p130_p3)   ;;  %vm228_vm0 = vcmask (!%p130_p3), 523264   ;;  %v834_v16 = vmov (!%p130_p3), 0.0  }
   0x7   : > { %133 = sbr.rel (%p130_p3) target bundleno = 508 (0x1fc), region = 28  ;;  %666 = vmatprep.subr.bf16.mxu0 (!%p130_p3), %v784_v0  ;;  %716 = vmatprep.subr.bf16.mxu1 (!%p130_p3), %v784_v0  ;;  %v787_v5 = vld [vmem:[%s963_s1 + $0x18] sm:$0xff] (!%p130_p3)   ;;  %v838_v17 = vmov (!%p130_p3), 0.0   ;;  %s923_s29 = smov (!%p130_p3), 0  }
   0x8   : > { %667 = vmatpush3.bf16.msra.mxu0 (!%p130_p3), %v784_v0  ;;  %720 = vmatpush3.bf16.msra.mxu1 (!%p130_p3), %v784_v0 }
   0x9   : > { %668 = vmatprep.subr.bf16.mxu0 (!%p130_p3), %v785_v1  ;;  %717 = vmatprep.subr.bf16.mxu1 (!%p130_p3), %v785_v1 }
   0xc   : > { %669 = vmatpush3.bf16.msra.mxu0 (!%p130_p3), %v785_v1  ;;  %721 = vmatpush3.bf16.msra.mxu1 (!%p130_p3), %v785_v1 }
   0xd   : > { %670 = vmatprep.subr.bf16.mxu0 (!%p130_p3), %v786_v2  ;;  %718 = vmatprep.subr.bf16.mxu1 (!%p130_p3), %v786_v2 }
   0xe   : > { %s970_s9 = smov (!%p154_p4, %s824_s9), 1 }
   0xf   : > { %s646_s19 = sshll.u32 %s970_s9, 5  ;;  %s647_s25 = sshll.u32 %s970_s9, 6 }
  0x10   : > { %s161_s22 = scalar_lea.vmem %s962_s0, %s646_s19  ;;  %671 = vmatpush3.bf16.msra.mxu0 %v786_v2  ;;  %722 = vmatpush3.bf16.msra.mxu1 %v786_v2  ;;  %s913_s28 = scalar_lea.vmem %s964_s2, %s647_s25 }
  0x11   : > { %v788_v3 = vld [vmem:[%s161_s22] sm:$0xff]   ;;  %v789_v4 = vld [vmem:[%s161_s22 + $0x10] sm:$0xff]   ;;  %672 = vmatprep.subr.bf16.mxu0 %v787_v5  ;;  %719 = vmatprep.subr.bf16.mxu1 %v787_v5  ;;  %v790_v6 = vld [vmem:[%s161_s22 + $0x8] sm:$0xff]  }
  0x12   : > { %674 = vmatprep.mubr.msk.bf16.mxu0 %vm228_vm0, %v788_v3  ;;  %678 = vmatprep.mubr.msk.bf16.mxu1 %vm228_vm0, %v789_v4  ;;  %v791_v7 = vld [vmem:[%s161_s22 + $0x18] sm:$0xff]  }
  0x14   : > { %673 = vmatpush3.bf16.msra.mxu0 %v787_v5  ;;  %723 = vmatpush3.bf16.msra.mxu1 %v787_v5 }
  0x17   : > { %675 = vmatmul.mubr.msk.bf16.vlgmr.msra.gmra.mrb[0].mxu0 %vm228_vm0, %v790_v6  ;;  %679 = vmatmul.mubr.msk.bf16.vlgmr.msra.gmra.mrb[0].mxu1 %vm228_vm0, %v791_v7 }
  0xea   : > { %v676_v8 = vpop.f32.mrb[0].mxu0  ;;  %v680_v9 = vpop.f32.mrb[0].mxu1 }
  0xeb   : > { %308 = vst [vmem:[%s913_s28 + $0x10] sm:$0xff] %v676_v8  ;;  %312 = vst [vmem:[%s913_s28 + $0x30] sm:$0xff] %v680_v9  ;;  %v275_v10 = vpop.f32.mrb[1].mxu0  ;;  %v291_v11 = vpop.f32.mrb[1].mxu1 }
  0xec   : > { %306 = vst [vmem:[%s913_s28] sm:$0xff] %v275_v10  ;;  %310 = vst [vmem:[%s913_s28 + $0x20] sm:$0xff] %v291_v11  ;;  %v677_v12 = vpop.f32.mrb[2].mxu0  ;;  %v681_v13 = vpop.f32.mrb[2].mxu1 }
  0xed   : > { %309 = vst [vmem:[%s913_s28 + $0x18] sm:$0xff] %v677_v12  ;;  %313 = vst [vmem:[%s913_s28 + $0x38] sm:$0xff] %v681_v13  ;;  %v278_v14 = vpop.f32.mrb[3].mxu0  ;;  %v294_v15 = vpop.f32.mrb[3].mxu1 }
  0xee   : > { %307 = vst [vmem:[%s913_s28 + $0x8] sm:$0xff] %v278_v14  ;;  %311 = vst [vmem:[%s913_s28 + $0x28] sm:$0xff] %v294_v15 }
  0xef LB: >> { %v850_v18 = vmov 0.0|0.0   ;;  %s640_s30 = sshll.u32 %s844_s29, 5  ;;  %vm851_vm1 = vmmov 0   ;;  %v852_v19 = vmov 0.0   ;;  %vm328_vm2 = vcmask 261120   ;;  %s319_s29 = sadd.s32 1, %s844_s29   ;;  %s844_s29 = sphi %s923_s29, %s319_s29   ;;  %v840_v17 = vphi %v838_v17, %v839_v17   ;;  %v836_v16 = vphi %v834_v16, %v835_v16  }
  0xf0   : >> { %704 = vmatprep.subr.bf16.mxu0 %v850_v18  ;;  %710 = vmatprep.subr.bf16.mxu1 %v850_v18  ;;  %s323_s3 = scalar_lea.vmem %s913_s28, %s640_s30  ;;  %v853_v32 = vmov 1.0   ;;  %p316_p5 = scmp.ge.s32.totalorder %s319_s29, 2  }
  0xf1   : >> { %690 = vmatprep.mubr.msk.f32.mxu0 %vm851_vm1, %v852_v19  ;;  %701 = vmatprep.mubr.msk.f32.mxu1 %vm851_vm1, %v852_v19  ;;  %s933_s4 = smov (%p316_p5), 0  }
  0xf5   : >> { %v324_v20 = vld [vmem:[%s323_s3] sm:$0xff]  ;;  %v325_v21 = vld [vmem:[%s323_s3 + $0x8] sm:$0xff]  ;;  %v326_v22 = vld [vmem:[%s323_s3 + $0x10] sm:$0xff] }
  0xf6   : >> { %v705_v23 = vpack.c.bf16 %v325_v21, %v324_v20  ;;  %v403_v24 = vmul.f32 %v324_v20, %v324_v20  ;;  %v404_v25 = vmul.f32 %v325_v21, %v325_v21  ;;  %v327_v26 = vld [vmem:[%s323_s3 + $0x18] sm:$0xff]  ;;  %v405_v27 = vmul.f32 %v326_v22, %v326_v22 }
  0xf7   : >> { %v406_v28 = vmul.f32 %v327_v26, %v327_v26  ;;  %v708_v30 = vpack.c.bf16 %v327_v26, %v326_v22 }
  0xf8   : >> { %706 = vmatpush3.bf16.msra.mxu0 %v705_v23  ;;  %v711_v29 = vpack.c.bf16 %v404_v25, %v403_v24 }
  0xf9   : >> { %707 = vmatprep.subr.bf16.mxu0 %v850_v18  ;;  %v714_v31 = vpack.c.bf16 %v406_v28, %v405_v27 }
  0xfa   : >> { %712 = vmatpush3.bf16.msra.mxu1 %v711_v29 }
  0xfb   : >> { %713 = vmatprep.subr.bf16.mxu1 %v850_v18 }
  0xfc   : >> { %709 = vmatpush3.bf16.msra.mxu0 %v708_v30 }
  0xfe   : >> { %715 = vmatpush3.bf16.msra.mxu1 %v714_v31 }
  0xff   : >> { %691 = vmatmul.mubr.msk.f32.vlgmr.msra.gmra.mrb[0].mxu0 %vm328_vm2, %v853_v32 }
 0x101   : >> { %702 = vmatmul.mubr.msk.f32.vlgmr.msra.gmra.mrb[0].mxu1 %vm328_vm2, %v853_v32 }
 0x1d1   : > { %318 = sbr.rel (!%p316_p5) target bundleno = 239 (0xef), region = 74 }
 0x1d2   : >> { %v398_v33 = vpop.f32.mrb[0].mxu0 }
 0x1d3   : >> { %v402_v34 = vadd.f32 %v840_v17, %v398_v33   ;;  %v692_v35 = vpop.f32.mrb[1].mxu0 }
 0x1d4   : >> { %v473_v36 = vpop.f32.mrb[0].mxu1 }
 0x1d5   : >> { %v477_v37 = vadd.f32 %v836_v16, %v473_v36   ;;  %v703_v38 = vpop.f32.mrb[1].mxu1  ;;  %v839_v17 = vmov %v402_v34   ;;  %v478_v39 = vmul.f32 (%p316_p5), 0.015625, %v402_v34 }
 0x1d7   : >> { %v835_v16 = vmov %v477_v37   ;;  %v479_v40 = vmul.f32 (%p316_p5), 0.015625, %v477_v37  ;;  %v480_v41 = vmul.f32 (%p316_p5), %v478_v39, %v478_v39 }
 0x1d9   : > { %v481_v42 = vsub.f32 %v479_v40, %v480_v41 }
 0x1db   : > { %v482_v43 = vmax.f32 %v481_v42, 0.0 }
 0x1dd   : > { %v483_v44 = vadd.f32 1e-05, %v482_v43 }
 0x1df   : > { %792 = vrsqrt.f32 %v483_v44 }
 0x1e9   : > { %v793_v45 = vpop.eup %792 }
 0x1ea   : > { %v485_v46 = vmul.f32 %v793_v45, %v478_v39 }
 0x1eb LB: >> { %v498_v47 = vlaneseq  ;;  %s643_s5 = sshll.u32 %s848_s4, 5  ;;  %s491_s4 = sadd.s32 1, %s848_s4   ;;  %s848_s4 = sphi %s933_s4, %s491_s4  }
 0x1ec   : >> { %s940_s6 = scalar_lea.vmem %s913_s28, %s643_s5  ;;  %p488_p6 = scmp.ge.s32.totalorder %s491_s4, 2  }
 0x1ed   : >> { %v499_v48 = vshrl.u32 %v498_v47, 7  ;;  %v494_v49 = vld [vmem:[%s940_s6] sm:$0xff]  ;;  %v495_v51 = vld [vmem:[%s940_s6 + $0x8] sm:$0xff]  ;;  %v496_v52 = vld [vmem:[%s940_s6 + $0x10] sm:$0xff] }
 0x1ee   : >> { %v497_v53 = vld [vmem:[%s940_s6 + $0x18] sm:$0xff] }
 0x1ef   : >> { %v500_v50 = vsub.s32 0, %v499_v48 }
 0x1f1   : >> { %v501_v54 = vrot.slane %v793_v45, %v500_v50  ;;  %v509_v55 = vrot.slane %v485_v46, %v500_v50 }
 0x1f3   : >> { %v502_v56 = vmul.f32 %v501_v54, %v494_v49  ;;  %v503_v57 = vmul.f32 %v501_v54, %v495_v51  ;;  %v504_v58 = vmul.f32 %v501_v54, %v496_v52  ;;  %v505_v59 = vmul.f32 %v501_v54, %v497_v53 }
 0x1f5   : >> { %v510_v60 = vsub.f32 %v502_v56, %v509_v55  ;;  %v511_v61 = vsub.f32 %v503_v57, %v509_v55  ;;  %v512_v62 = vsub.f32 %v504_v58, %v509_v55  ;;  %v513_v63 = vsub.f32 %v505_v59, %v509_v55  ;;  %490 = sbr.rel (!%p488_p6) target bundleno = 491 (0x1eb), region = 85 }
 0x1f7   : >> { %vm514_vm3 = vcmp.ge.f32.partialorder %v510_v60, 0.0  ;;  %v518_v0 = vmul.f32 0.2, %v510_v60  ;;  %vm515_vm4 = vcmp.ge.f32.partialorder %v511_v61, 0.0  ;;  %v519_v1 = vmul.f32 0.2, %v511_v61 }
 0x1f8   : >> { %vm516_vm5 = vcmp.ge.f32.partialorder %v512_v62, 0.0  ;;  %v520_v2 = vmul.f32 0.2, %v512_v62  ;;  %vm517_vm6 = vcmp.ge.f32.partialorder %v513_v63, 0.0  ;;  %v521_v3 = vmul.f32 0.2, %v513_v63 }
 0x1f9   : >> { %v522_v4 = vsel %vm514_vm3, %v510_v60, %v518_v0  ;;  %v523_v5 = vsel %vm515_vm4, %v511_v61, %v519_v1 }
 0x1fa   : >> { %526 = vst [vmem:[%s940_s6] sm:$0xff] %v522_v4  ;;  %527 = vst [vmem:[%s940_s6 + $0x8] sm:$0xff] %v523_v5  ;;  %v524_v6 = vsel %vm516_vm5, %v512_v62, %v520_v2  ;;  %v525_v7 = vsel %vm517_vm6, %v513_v63, %v521_v3 }
 0x1fb   : >> { %528 = vst [vmem:[%s940_s6 + $0x10] sm:$0xff] %v524_v6  ;;  %529 = vst [vmem:[%s940_s6 + $0x18] sm:$0xff] %v525_v7 }
 0x1fc PF: > { %s12_s11 = sadd.s32 1, %s832_s11   ;;  %s965_s9 = smov %s828_s10 }
 0x1fd   : > { %p9_p7 = scmp.ge.s32.totalorder %s12_s11, 4   ;;  %s966_s10 = smov %s968_s12 }
 0x1ff   :  { %11 = sbr.rel (!%p9_p7) target bundleno = 2 (0x2), region = 96 }

</bundles_post_ra>
